<compile_context>
chip_gen: v5e
topology: v5e:2x2
jax: 0.10.0
libtpu: 0.0.40
codegen_flags: <defaults>
</compile_context>

<pallas_src>
import functools

import jax
import jax.numpy as jnp
from jax.experimental import pallas as pl
from jax.experimental.pallas import tpu as pltpu


def _round_up(n, m):
    return ((n + m - 1) // m) * m


# ---------------------------------------------------------------------------
# Kernels (batch-major layout: x tile is (bt, F), output tile is (bt, O))
# ---------------------------------------------------------------------------
def _mlp2_kernel(x_ref, w1_ref, b1_ref, w2_ref, b2_ref, o_ref):
    # x: (bt, F)  w1: (F, M)  b1: (1, M)  w2: (M, O)  b2: (1, O)  o: (bt, O)
    h = jnp.dot(x_ref[...], w1_ref[...], preferred_element_type=jnp.float32)
    h = jnp.maximum(h + b1_ref[...], 0.0)          # bias + ReLU on the VPU
    y = jnp.dot(h, w2_ref[...], preferred_element_type=jnp.float32)
    o_ref[...] = (y + b2_ref[...]).astype(o_ref.dtype)


def _mlp1_kernel(x_ref, w_ref, b_ref, o_ref):
    y = jnp.dot(x_ref[...], w_ref[...], preferred_element_type=jnp.float32)
    o_ref[...] = (y + b_ref[...]).astype(o_ref.dtype)


# ---------------------------------------------------------------------------
# Batch tiling: pad B only to a multiple of 128; grid = cdiv(B_pad, bt);
# keep >= 2 grid steps when possible so v7x's two TensorCores both get work.
# ---------------------------------------------------------------------------
def _batch_tiling(B, block_b):
    block_b = max(128, _round_up(block_b, 128))      # lane-aligned tile
    B_pad = _round_up(B, 128)
    bt = min(block_b, B_pad)
    if B_pad > 128:
        bt = min(bt, _round_up(pl.cdiv(B_pad, 2), 128))
    grid = pl.cdiv(B_pad, bt)
    return B_pad, bt, grid


_VMEM_LIMIT = 32 * 1024 * 1024   # generous on every generation; tiles are <8 MiB


# ---------------------------------------------------------------------------
# Wrappers
# ---------------------------------------------------------------------------
@functools.partial(jax.jit, static_argnames=("block_b",))
def audio_model_two_layer(x, w1, b1, w2, b2, *, block_b=4096):
    """x: [B, F]; w1: [F, M]; b1: [1, M]; w2: [M, O]; b2: [1, O] -> [B, O]."""
    B, F = x.shape
    M = w1.shape[1]
    O = w2.shape[1]
    out_dtype = x.dtype

    B_pad, bt, grid = _batch_tiling(B, block_b)
    x_pad = jnp.pad(x, ((0, B_pad - B), (0, 0)))     # tiny pad; no transpose/cast

    b1r = b1.reshape(1, M)
    b2r = b2.reshape(1, O)

    cost = pl.CostEstimate(
        flops=2 * B_pad * (F * M + M * O),
        transcendentals=0,
        bytes_accessed=(x_pad.size * x_pad.dtype.itemsize
                        + B_pad * O * jnp.dtype(out_dtype).itemsize
                        + w1.size * w1.dtype.itemsize
                        + w2.size * w2.dtype.itemsize
                        + (M + O) * 4),
    )

    out = pl.pallas_call(
        _mlp2_kernel,
        out_shape=jax.ShapeDtypeStruct((B_pad, O), out_dtype),
        grid_spec=pltpu.PrefetchScalarGridSpec(
            num_scalar_prefetch=0,
            grid=(grid,),
            in_specs=[
                pl.BlockSpec((bt, F), lambda i: (i, 0)),   # streamed x tile
                pl.BlockSpec((F, M), lambda i: (0, 0)),    # resident W1
                pl.BlockSpec((1, M), lambda i: (0, 0)),    # resident b1
                pl.BlockSpec((M, O), lambda i: (0, 0)),    # resident W2
                pl.BlockSpec((1, O), lambda i: (0, 0)),    # resident b2
            ],
            out_specs=pl.BlockSpec((bt, O), lambda i: (i, 0)),
        ),
        compiler_params=pltpu.CompilerParams(
            dimension_semantics=("parallel",),
            vmem_limit_bytes=_VMEM_LIMIT),
        cost_estimate=cost,
    )(x_pad, w1, b1r, w2, b2r)

    return out[:B]                                   # batch-major; no transpose


@functools.partial(jax.jit, static_argnames=("block_b",))
def audio_model_one_layer(x, w, b, *, block_b=4096):
    """x: [B, F]; w: [F, O]; b: [1, O] -> [B, O]."""
    B, F = x.shape
    O = w.shape[1]
    out_dtype = x.dtype

    B_pad, bt, grid = _batch_tiling(B, block_b)
    x_pad = jnp.pad(x, ((0, B_pad - B), (0, 0)))

    br = b.reshape(1, O)

    cost = pl.CostEstimate(
        flops=2 * B_pad * F * O,
        transcendentals=0,
        bytes_accessed=(x_pad.size * x_pad.dtype.itemsize
                        + B_pad * O * jnp.dtype(out_dtype).itemsize
                        + w.size * w.dtype.itemsize
                        + O * 4),
    )

    out = pl.pallas_call(
        _mlp1_kernel,
        out_shape=jax.ShapeDtypeStruct((B_pad, O), out_dtype),
        grid_spec=pltpu.PrefetchScalarGridSpec(
            num_scalar_prefetch=0,
            grid=(grid,),
            in_specs=[
                pl.BlockSpec((bt, F), lambda i: (i, 0)),
                pl.BlockSpec((F, O), lambda i: (0, 0)),
                pl.BlockSpec((1, O), lambda i: (0, 0)),
            ],
            out_specs=pl.BlockSpec((bt, O), lambda i: (i, 0)),
        ),
        compiler_params=pltpu.CompilerParams(
            dimension_semantics=("parallel",),
            vmem_limit_bytes=_VMEM_LIMIT),
        cost_estimate=cost,
    )(x_pad, w, br)

    return out[:B]


# ---------------------------------------------------------------------------
# Deterministic parameter init (mimics nn.Linear's uniform(-1/sqrt(fan_in), ...))
# ---------------------------------------------------------------------------
def init_params(key, feature_dim, output_dim, two_layer):
    if two_layer:
        middle_dim = 128
        k1, k2, k3, k4 = jax.random.split(key, 4)
        s1 = 1.0 / jnp.sqrt(feature_dim)
        s2 = 1.0 / jnp.sqrt(middle_dim)
        w1 = jax.random.uniform(k1, (feature_dim, middle_dim), jnp.float32, -s1, s1)
        b1 = jax.random.uniform(k2, (1, middle_dim), jnp.float32, -s1, s1)
        w2 = jax.random.uniform(k3, (middle_dim, output_dim), jnp.float32, -s2, s2)
        b2 = jax.random.uniform(k4, (1, output_dim), jnp.float32, -s2, s2)
        return (w1, b1, w2, b2)
    else:
        k1, k2 = jax.random.split(key, 2)
        s = 1.0 / jnp.sqrt(feature_dim)
        w = jax.random.uniform(k1, (feature_dim, output_dim), jnp.float32, -s, s)
        b = jax.random.uniform(k2, (1, output_dim), jnp.float32, -s, s)
        return (w, b)


def reference_forward(x, params, two_layer):
    # Exact f32 semantics of the PyTorch module.
    if two_layer:
        w1, b1, w2, b2 = params
        h = jnp.maximum(x @ w1 + b1, 0.0)
        return h @ w2 + b2
    w, b = params
    return x @ w + b


if __name__ == "__main__":
    key = jax.random.PRNGKey(0)
    kx, kp1, kp2, kx2 = jax.random.split(key, 4)

    # Small shapes consistent with the module's forward (x: [batch, feature_dim]).
    batch, feature_dim, output_dim = 16, 32, 8
    x = jax.random.normal(kx, (batch, feature_dim), jnp.float32)

    # ---------------- two_layer = True ----------------
    p2 = init_params(kp1, feature_dim, output_dim, two_layer=True)
    y2 = jax.block_until_ready(audio_model_two_layer(x, *p2))
    assert y2.shape == (batch, output_dim)
    assert jnp.allclose(y2, reference_forward(x, p2, True), atol=1e-2, rtol=1e-2)

    # ---------------- two_layer = False ----------------
    p1 = init_params(kp2, feature_dim, output_dim, two_layer=False)
    y1 = jax.block_until_ready(audio_model_one_layer(x, *p1))
    assert y1.shape == (batch, output_dim)
    assert jnp.allclose(y1, reference_forward(x, p1, False), atol=1e-2, rtol=1e-2)

    # ---------------- multi-tile path (grid > 1, partial last block) ----------------
    xb = jax.random.normal(kx2, (300, feature_dim), jnp.float32)
    y2b = jax.block_until_ready(audio_model_two_layer(xb, *p2, block_b=256))
    assert y2b.shape == (300, output_dim)
    assert jnp.allclose(y2b, reference_forward(xb, p2, True), atol=1e-2, rtol=1e-2)

    print("KERNEL_OK")
</pallas_src>

<mosaic_0001>
module attributes {stable_mosaic.version = 11 : i64} {
  func.func @_mlp2_kernel(%arg0: i32, %arg1: memref<128x32xf32, #tpu.memory_space<vmem>>, %arg2: memref<32x128xf32, #tpu.memory_space<vmem>>, %arg3: memref<1x128xf32, #tpu.memory_space<vmem>>, %arg4: memref<128x8xf32, #tpu.memory_space<vmem>>, %arg5: memref<1x8xf32, #tpu.memory_space<vmem>>, %arg6: memref<128x8xf32, #tpu.memory_space<vmem>>) attributes {dimension_semantics = [#tpu.dimension_semantics<parallel>], iteration_bounds = array<i64: 1>, scalar_prefetch = 0 : i64, scratch_operands = 0 : i64, tpu.core_type = #tpu.core_type<tc>, window_params = [{transform_indices = @transform_0, window_bounds = array<i64: 128, 32>}, {pipeline_mode = #tpu.pipeline_mode<synchronous>, transform_indices = @transform_1, window_bounds = array<i64: 32, 128>}, {pipeline_mode = #tpu.pipeline_mode<synchronous>, transform_indices = @transform_2, window_bounds = array<i64: 1, 128>}, {pipeline_mode = #tpu.pipeline_mode<synchronous>, transform_indices = @transform_3, window_bounds = array<i64: 128, 8>}, {pipeline_mode = #tpu.pipeline_mode<synchronous>, transform_indices = @transform_4, window_bounds = array<i64: 1, 8>}, {transform_indices = @transform_5, window_bounds = array<i64: 128, 8>}]} {
    %c0 = arith.constant 0 : index
    %c0_0 = arith.constant 0 : index
    %0 = vector.load %arg1[%c0, %c0_0] : memref<128x32xf32, #tpu.memory_space<vmem>>, vector<128x32xf32>
    %c0_1 = arith.constant 0 : index
    %c0_2 = arith.constant 0 : index
    %1 = vector.load %arg2[%c0_1, %c0_2] : memref<32x128xf32, #tpu.memory_space<vmem>>, vector<32x128xf32>
    %cst = arith.constant dense<0.000000e+00> : vector<128x128xf32>
    %2 = tpu.matmul %0, %1, %cst {dimension_numbers = #tpu.dot_dimension_numbers<[1], [0], [0], [1], [0, 0, 1, 1], [], []>} : vector<128x32xf32>, vector<32x128xf32>, vector<128x128xf32> -> vector<128x128xf32>
    %c0_3 = arith.constant 0 : index
    %c0_4 = arith.constant 0 : index
    %3 = vector.load %arg3[%c0_3, %c0_4] : memref<1x128xf32, #tpu.memory_space<vmem>>, vector<1x128xf32>
    %4 = vector.broadcast %3 : vector<1x128xf32> to vector<128x128xf32>
    %5 = arith.addf %2, %4 : vector<128x128xf32>
    %cst_5 = arith.constant 0.000000e+00 : f32
    %6 = vector.broadcast %cst_5 : f32 to vector<128x128xf32>
    %7 = arith.maximumf %5, %6 : vector<128x128xf32>
    %c0_6 = arith.constant 0 : index
    %c0_7 = arith.constant 0 : index
    %8 = vector.load %arg4[%c0_6, %c0_7] : memref<128x8xf32, #tpu.memory_space<vmem>>, vector<128x8xf32>
    %cst_8 = arith.constant dense<0.000000e+00> : vector<128x8xf32>
    %9 = tpu.matmul %7, %8, %cst_8 {dimension_numbers = #tpu.dot_dimension_numbers<[1], [0], [0], [1], [0, 0, 1, 1], [], []>} : vector<128x128xf32>, vector<128x8xf32>, vector<128x8xf32> -> vector<128x8xf32>
    %c0_9 = arith.constant 0 : index
    %c0_10 = arith.constant 0 : index
    %10 = vector.load %arg5[%c0_9, %c0_10] : memref<1x8xf32, #tpu.memory_space<vmem>>, vector<1x8xf32>
    %11 = vector.broadcast %10 : vector<1x8xf32> to vector<128x8xf32>
    %12 = arith.addf %9, %11 : vector<128x8xf32>
    %c0_11 = arith.constant 0 : index
    %c0_12 = arith.constant 0 : index
    %13 = vector.load %arg6[%c0_11, %c0_12] : memref<128x8xf32, #tpu.memory_space<vmem>>, vector<128x8xf32>
    tpu.vector_store %arg6[%c0_11, %c0_12], %12 {strides = array<i32>} : memref<128x8xf32, #tpu.memory_space<vmem>>, vector<128x8xf32>,
    return
  }
  func.func @transform_0(%arg0: i32) -> (i32, i32) {
    %c0_i32 = arith.constant 0 : i32
    %c0_i32_0 = arith.constant 0 : i32
    return %arg0, %c0_i32 : i32, i32
  }
  func.func @transform_1(%arg0: i32) -> (i32, i32) {
    %c0_i32 = arith.constant 0 : i32
    %c0_i32_0 = arith.constant 0 : i32
    %c0_i32_1 = arith.constant 0 : i32
    return %c0_i32, %c0_i32_0 : i32, i32
  }
  func.func @transform_2(%arg0: i32) -> (i32, i32) {
    %c0_i32 = arith.constant 0 : i32
    %c0_i32_0 = arith.constant 0 : i32
    %c0_i32_1 = arith.constant 0 : i32
    return %c0_i32, %c0_i32_0 : i32, i32
  }
  func.func @transform_3(%arg0: i32) -> (i32, i32) {
    %c0_i32 = arith.constant 0 : i32
    %c0_i32_0 = arith.constant 0 : i32
    %c0_i32_1 = arith.constant 0 : i32
    return %c0_i32, %c0_i32_0 : i32, i32
  }
  func.func @transform_4(%arg0: i32) -> (i32, i32) {
    %c0_i32 = arith.constant 0 : i32
    %c0_i32_0 = arith.constant 0 : i32
    %c0_i32_1 = arith.constant 0 : i32
    return %c0_i32, %c0_i32_0 : i32, i32
  }
  func.func @transform_5(%arg0: i32) -> (i32, i32) {
    %c0_i32 = arith.constant 0 : i32
    %c0_i32_0 = arith.constant 0 : i32
    return %arg0, %c0_i32 : i32, i32
  }
}

</mosaic_0001>

<bundles_post_ra>
// kernel: audio_model_two_layer.1
= control target key start
LH: loop header
LB: loop body
LE: loop exit
PB: predicated region body
PF: predicated region fallthrough
CT: control target
= control target key end

     0   :  { %vm44_vm0 = vcmask 261120   ;;  %vm259_vm1 = vcmask 64512   ;;  %s558_s1 = inlined_call_operand.vmem [shape: f32[32,128], index: 1, kind: input, shape index: {}]   ;;  %s559_s0 = inlined_call_operand.vmem [shape: f32[128,32], index: 0, kind: input, shape index: {}]   ;;  %s560_s2 = inlined_call_operand.vmem [shape: f32[1,128], index: 2, kind: input, shape index: {}]   ;;  %s561_s3 = inlined_call_operand.vmem [shape: f32[128,8], index: 3, kind: input, shape index: {}]   ;;  %s562_s4 = inlined_call_operand.vmem [shape: f32[1,8], index: 4, kind: input, shape index: {}]   ;;  %s563_s5 = inlined_call_operand.vmem [shape: f32[128,8], index: 5, kind: output, shape index: {}]  }
   0x1   :  { %v39_v0 = vld [vmem:[%s558_s1 + $0x18] sm:$0xff]  ;;  %v38_v1 = vld [vmem:[%s558_s1 + $0x10] sm:$0xff]  ;;  %v37_v2 = vld [vmem:[%s558_s1 + $0x8] sm:$0xff] }
   0x2   :  { %105 = vmatpush.msra.mxu0 %v39_v0  ;;  %296 = vmatpush.msra.mxu3 %v39_v0  ;;  %v36_v3 = vld [vmem:[%s558_s1] sm:$0xff]  ;;  %v21_v5 = vld [vmem:[%s559_s0 + $0x8] sm:$0xff]  ;;  %v22_v6 = vld [vmem:[%s559_s0 + $0x10] sm:$0xff] }
   0x3   :  { %v20_v4 = vld [vmem:[%s559_s0] sm:$0xff]  ;;  %v23_v7 = vld [vmem:[%s559_s0 + $0x18] sm:$0xff]  ;;  %v30_v8 = vld [vmem:[%s559_s0 + $0x50] sm:$0xff] }
   0x4   :  { %106 = vmatpush.msra.mxu0 %v38_v1  ;;  %297 = vmatpush.msra.mxu3 %v38_v1  ;;  %v24_v9 = vld [vmem:[%s559_s0 + $0x20] sm:$0xff]  ;;  %v31_v10 = vld [vmem:[%s559_s0 + $0x58] sm:$0xff]  ;;  %v25_v11 = vld [vmem:[%s559_s0 + $0x28] sm:$0xff] }
   0x5   :  { %v32_v12 = vld [vmem:[%s559_s0 + $0x60] sm:$0xff]  ;;  %v189_v13 = vld [vmem:[%s561_s3 + $0x78] sm:$0xff]  ;;  %v188_v14 = vld [vmem:[%s561_s3 + $0x70] sm:$0xff] }
   0x6   :  { %107 = vmatpush.msra.mxu0 %v37_v2  ;;  %298 = vmatpush.msra.mxu3 %v37_v2  ;;  %v187_v15 = vld [vmem:[%s561_s3 + $0x68] sm:$0xff]  ;;  %v26_v16 = vld [vmem:[%s559_s0 + $0x30] sm:$0xff]  ;;  %v186_v17 = vld [vmem:[%s561_s3 + $0x60] sm:$0xff] }
   0x7   :  { %194 = vmatpush.msra.mxu1 %v189_v13  ;;  %300 = vmatpush.msra.mxu2 %v189_v13  ;;  %v33_v18 = vld [vmem:[%s559_s0 + $0x68] sm:$0xff]  ;;  %v185_v19 = vld [vmem:[%s561_s3 + $0x58] sm:$0xff]  ;;  %v184_v20 = vld [vmem:[%s561_s3 + $0x50] sm:$0xff] }
   0x8   :  { %108 = vmatpush.msra.mxu0 %v36_v3  ;;  %299 = vmatpush.msra.mxu3 %v36_v3  ;;  %v183_v21 = vld [vmem:[%s561_s3 + $0x48] sm:$0xff]  ;;  %v27_v22 = vld [vmem:[%s559_s0 + $0x38] sm:$0xff]  ;;  %v182_v23 = vld [vmem:[%s561_s3 + $0x40] sm:$0xff] }
   0x9   :  { %280 = vmatmul.msk.f32.vlgmr.msra.gmra.mxu0 %vm44_vm0, %v20_v4  ;;  %290 = vmatmul.msk.f32.vlgmr.msra.gmra.mxu3 %vm44_vm0, %v30_v8  ;;  %v34_v24 = vld [vmem:[%s559_s0 + $0x70] sm:$0xff]  ;;  %v181_v25 = vld [vmem:[%s561_s3 + $0x38] sm:$0xff]  ;;  %v179_v27 = vld [vmem:[%s561_s3 + $0x28] sm:$0xff] }
   0xa   :  { %301 = vmatpush.msrb.mxu3 %v189_v13  ;;  %195 = vmatpush.msra.mxu1 %v188_v14  ;;  %v180_v26 = vld [vmem:[%s561_s3 + $0x30] sm:$0xff]  ;;  %v28_v28 = vld [vmem:[%s559_s0 + $0x40] sm:$0xff]  ;;  %v35_v30 = vld [vmem:[%s559_s0 + $0x78] sm:$0xff] }
   0xb   :  { %302 = vmatpush.msra.mxu2 %v188_v14  ;;  %v178_v29 = vld [vmem:[%s561_s3 + $0x20] sm:$0xff]  ;;  %v177_v31 = vld [vmem:[%s561_s3 + $0x18] sm:$0xff]  ;;  %v29_v32 = vld [vmem:[%s559_s0 + $0x48] sm:$0xff] }
   0xc   :  { %303 = vmatpush.msrb.mxu3 %v188_v14  ;;  %196 = vmatpush.msra.mxu1 %v187_v15  ;;  %v176_v33 = vld [vmem:[%s561_s3 + $0x10] sm:$0xff]  ;;  %v175_v34 = vld [vmem:[%s561_s3 + $0x8] sm:$0xff]  ;;  %v174_v35 = vld [vmem:[%s561_s3] sm:$0xff] }
   0xd   :  { %304 = vmatpush.msra.mxu2 %v187_v15  ;;  %v332_v36 = vld [vmem:[%s560_s2] ss:$0 sm:$0xff] }
   0xe   :  { %305 = vmatpush.msrb.mxu3 %v187_v15  ;;  %197 = vmatpush.msra.mxu1 %v186_v17 }
   0xf   :  { %306 = vmatpush.msra.mxu2 %v186_v17 }
  0x10   :  { %198 = vmatpush.msra.mxu1 %v185_v19  ;;  %307 = vmatpush.msrb.mxu3 %v186_v17 }
  0x11   :  { %281 = vmatmul.msk.f32.gmra.mxu0 %vm44_vm0, %v21_v5  ;;  %291 = vmatmul.msk.f32.gmra.mxu3 %vm44_vm0, %v31_v10 }
  0x12   :  { %308 = vmatpush.msra.mxu2 %v185_v19  ;;  %199 = vmatpush.msra.mxu1 %v184_v20 }
  0x13   :  { %309 = vmatpush.msrb.mxu3 %v185_v19 }
  0x14   :  { %310 = vmatpush.msra.mxu2 %v184_v20  ;;  %200 = vmatpush.msra.mxu1 %v183_v21 }
  0x15   :  { %311 = vmatpush.msrb.mxu3 %v184_v20 }
  0x16   :  { %312 = vmatpush.msra.mxu2 %v183_v21  ;;  %201 = vmatpush.msra.mxu1 %v182_v23 }
  0x17   :  { %313 = vmatpush.msrb.mxu3 %v183_v21  ;;  %v333_v21 = vld [vmem:[%s562_s4] ss:$0 sm:$0xff] }
  0x18   :  { %314 = vmatpush.msra.mxu2 %v182_v23  ;;  %202 = vmatpush.msra.mxu1 %v181_v25 }
  0x19   :  { %282 = vmatmul.msk.f32.gmra.mxu0 %vm44_vm0, %v22_v6  ;;  %292 = vmatmul.msk.f32.gmra.mxu3 %vm44_vm0, %v32_v12 }
  0x1a   :  { %316 = vmatpush.msra.mxu2 %v181_v25  ;;  %203 = vmatpush.msra.mxu1 %v180_v26 }
  0x1b   :  { %315 = vmatpush.msrb.mxu3 %v182_v23 }
  0x1c   :  { %318 = vmatpush.msra.mxu2 %v180_v26  ;;  %204 = vmatpush.msra.mxu1 %v179_v27 }
  0x1d   :  { %317 = vmatpush.msrb.mxu3 %v181_v25 }
  0x1e   :  { %320 = vmatpush.msra.mxu2 %v179_v27  ;;  %205 = vmatpush.msra.mxu1 %v178_v29 }
  0x1f   :  { %319 = vmatpush.msrb.mxu3 %v180_v26 }
  0x20   :  { %322 = vmatpush.msra.mxu2 %v178_v29  ;;  %206 = vmatpush.msra.mxu1 %v177_v31 }
  0x21   :  { %283 = vmatmul.msk.f32.gmra.mxu0 %vm44_vm0, %v23_v7  ;;  %293 = vmatmul.msk.f32.gmra.mxu3 %vm44_vm0, %v33_v18 }
  0x22   :  { %324 = vmatpush.msra.mxu2 %v177_v31  ;;  %321 = vmatpush.msrb.mxu3 %v179_v27 }
  0x23   :  { %207 = vmatpush.msra.mxu1 %v176_v33 }
  0x24   :  { %323 = vmatpush.msrb.mxu3 %v178_v29  ;;  %326 = vmatpush.msra.mxu2 %v176_v33 }
  0x25   :  { %208 = vmatpush.msra.mxu1 %v175_v34 }
  0x26   :  { %325 = vmatpush.msrb.mxu3 %v177_v31  ;;  %328 = vmatpush.msra.mxu2 %v175_v34 }
  0x27   :  { %209 = vmatpush.msra.mxu1 %v174_v35 }
  0x28   :  { %327 = vmatpush.msrb.mxu3 %v176_v33  ;;  %330 = vmatpush.msra.mxu2 %v174_v35 }
  0x29   :  { %284 = vmatmul.msk.f32.gmra.mxu0 %vm44_vm0, %v24_v9  ;;  %294 = vmatmul.msk.f32.gmra.mxu3 %vm44_vm0, %v34_v24 }
  0x2a   :  { %329 = vmatpush.msrb.mxu3 %v175_v34 }
  0x2c   :  { %331 = vmatpush.msrb.mxu3 %v174_v35 }
  0x31   :  { %285 = vmatmul.msk.f32.gmra.mxu0 %vm44_vm0, %v25_v11  ;;  %295 = vmatmul.msk.f32.gmra.mxu3 %vm44_vm0, %v35_v30 }
  0x39   :  { %286 = vmatmul.msk.f32.gmra.mxu0 %vm44_vm0, %v26_v16 }
  0x41   :  { %287 = vmatmul.msk.f32.gmra.mxu0 %vm44_vm0, %v27_v22 }
  0x49   :  { %288 = vmatmul.msk.f32.gmra.mxu0 %vm44_vm0, %v28_v28 }
  0x51   :  { %289 = vmatmul.msk.f32.gmra.mxu0 %vm44_vm0, %v29_v32 }
  0x86   :  { %v110_v37 = vpop.f32.mrf.mxu0 }
  0x87   :  { %v111_v38 = vadd.f32 %v332_v36, %v110_v37 }
  0x89   :  { %v158_v39 = vmax.f32 %v111_v38, 0.0 }
  0x8b   :  { %210 = vmatmul.f32.vlgmr.msra.gmra.mxu1 %v158_v39 }
  0x8c   :  { %v140_v50 = vpop.f32.mrf.mxu3 }
  0x8d   :  { %v141_v13 = vadd.f32 %v332_v36, %v140_v50 }
  0x8e   :  { %v113_v40 = vpop.f32.mrf.mxu0 }
  0x8f   :  { %v114_v41 = vadd.f32 %v332_v36, %v113_v40  ;;  %v168_v14 = vmax.f32 %v141_v13, 0.0 }
  0x91   :  { %v159_v42 = vmax.f32 %v114_v41, 0.0 }
  0x93   :  { %213 = vmatmul.f32.gmra.mxu1 %v159_v42 }
  0x94   :  { %v143_v54 = vpop.f32.mrf.mxu3 }
  0x95   :  { %v144_v15 = vadd.f32 %v332_v36, %v143_v54 }
  0x96   :  { %v116_v43 = vpop.f32.mrf.mxu0 }
  0x97   :  { %v117_v44 = vadd.f32 %v332_v36, %v116_v43  ;;  %v169_v16 = vmax.f32 %v144_v15, 0.0 }
  0x99   :  { %v160_v45 = vmax.f32 %v117_v44, 0.0 }
  0x9b   :  { %216 = vmatmul.f32.gmra.mxu1 %v160_v45 }
  0x9c   :  { %v146_v58 = vpop.f32.mrf.mxu3 }
  0x9d   :  { %v147_v17 = vadd.f32 %v332_v36, %v146_v58 }
  0x9e   :  { %v119_v46 = vpop.f32.mrf.mxu0 }
  0x9f   :  { %v120_v47 = vadd.f32 %v332_v36, %v119_v46  ;;  %v170_v18 = vmax.f32 %v147_v17, 0.0 }
  0xa1   :  { %v161_v48 = vmax.f32 %v120_v47, 0.0 }
  0xa3   :  { %219 = vmatmul.f32.gmra.mxu1 %v161_v48 }
  0xa4   :  { %v149_v62 = vpop.f32.mrf.mxu3 }
  0xa5   :  { %v150_v19 = vadd.f32 %v332_v36, %v149_v62 }
  0xa6   :  { %v122_v49 = vpop.f32.mrf.mxu0 }
  0xa7   :  { %v123_v51 = vadd.f32 %v332_v36, %v122_v49  ;;  %v171_v20 = vmax.f32 %v150_v19, 0.0 }
  0xa9   :  { %v162_v52 = vmax.f32 %v123_v51, 0.0 }
  0xab   :  { %222 = vmatmul.f32.gmra.mxu1 %v162_v52 }
  0xac   :  { %v152_v2 = vpop.f32.mrf.mxu3 }
  0xad   :  { %v153_v4 = vadd.f32 %v332_v36, %v152_v2 }
  0xae   :  { %v125_v53 = vpop.f32.mrf.mxu0 }
  0xaf   :  { %v126_v55 = vadd.f32 %v332_v36, %v125_v53  ;;  %v172_v6 = vmax.f32 %v153_v4, 0.0 }
  0xb1   :  { %v163_v56 = vmax.f32 %v126_v55, 0.0  ;;  %252 = vmatmul.f32.vlgmr.msrb.gmra.mxu3 %v172_v6 }
  0xb3   :  { %225 = vmatmul.f32.gmra.mxu1 %v163_v56 }
  0xb4   :  { %v155_v8 = vpop.f32.mrf.mxu3 }
  0xb5   :  { %v156_v10 = vadd.f32 %v332_v36, %v155_v8 }
  0xb6   :  { %v128_v57 = vpop.f32.mrf.mxu0 }
  0xb7   :  { %v129_v59 = vadd.f32 %v332_v36, %v128_v57  ;;  %v173_v12 = vmax.f32 %v156_v10, 0.0 }
  0xb9   :  { %v164_v60 = vmax.f32 %v129_v59, 0.0  ;;  %255 = vmatmul.f32.gmra.mxu3 %v173_v12 }
  0xbb   :  { %228 = vmatmul.f32.gmra.mxu1 %v164_v60 }
  0xbe   :  { %v131_v61 = vpop.f32.mrf.mxu0 }
  0xbf   :  { %v132_v63 = vadd.f32 %v332_v36, %v131_v61 }
  0xc1   :  { %v165_v0 = vmax.f32 %v132_v63, 0.0 }
  0xc3   :  { %231 = vmatmul.f32.vlgmr.msra.gmra.mxu2 %v165_v0 }
  0xc6   :  { %v134_v1 = vpop.f32.mrf.mxu0 }
  0xc7   :  { %v135_v3 = vadd.f32 %v332_v36, %v134_v1 }
  0xc9   :  { %v166_v5 = vmax.f32 %v135_v3, 0.0 }
  0xcb   :  { %234 = vmatmul.f32.gmra.mxu2 %v166_v5 }
  0xce   :  { %v137_v7 = vpop.f32.mrf.mxu0 }
  0xcf   :  { %v138_v9 = vadd.f32 %v332_v36, %v137_v7 }
  0xd1   :  { %v167_v11 = vmax.f32 %v138_v9, 0.0 }
  0xd3   :  { %237 = vmatmul.f32.gmra.mxu2 %v167_v11 }
  0xdb   :  { %240 = vmatmul.f32.gmra.mxu2 %v168_v14 }
  0xe3   :  { %243 = vmatmul.f32.gmra.mxu2 %v169_v16 }
  0xeb   :  { %246 = vmatmul.f32.gmra.mxu2 %v170_v18 }
  0xf3   :  { %249 = vmatmul.f32.gmra.mxu2 %v171_v20 }
 0x108   :  { %v211_v22 = vpop.f32.mrf.mxu1 }
 0x109   :  { %v212_v23 = vadd.f32 %v333_v21, %v211_v22 }
 0x10b   :  { %260 = vst.msk [vmem:[%s563_s5] sm:$0xff] %vm259_vm1, %v212_v23 }
 0x110   :  { %v214_v24 = vpop.f32.mrf.mxu1 }
 0x111   :  { %v215_v25 = vadd.f32 %v333_v21, %v214_v24 }
 0x113   :  { %261 = vst.msk [vmem:[%s563_s5 + $0x8] sm:$0xff] %vm259_vm1, %v215_v25 }
 0x118   :  { %v217_v26 = vpop.f32.mrf.mxu1 }
 0x119   :  { %v218_v27 = vadd.f32 %v333_v21, %v217_v26 }
 0x11b   :  { %262 = vst.msk [vmem:[%s563_s5 + $0x10] sm:$0xff] %vm259_vm1, %v218_v27 }
 0x120   :  { %v220_v28 = vpop.f32.mrf.mxu1 }
 0x121   :  { %v221_v29 = vadd.f32 %v333_v21, %v220_v28 }
 0x123   :  { %263 = vst.msk [vmem:[%s563_s5 + $0x18] sm:$0xff] %vm259_vm1, %v221_v29 }
 0x128   :  { %v223_v30 = vpop.f32.mrf.mxu1 }
 0x129   :  { %v224_v31 = vadd.f32 %v333_v21, %v223_v30 }
 0x12b   :  { %264 = vst.msk [vmem:[%s563_s5 + $0x20] sm:$0xff] %vm259_vm1, %v224_v31 }
 0x130   :  { %v226_v32 = vpop.f32.mrf.mxu1 }
 0x131   :  { %v227_v33 = vadd.f32 %v333_v21, %v226_v32 }
 0x133   :  { %265 = vst.msk [vmem:[%s563_s5 + $0x28] sm:$0xff] %vm259_vm1, %v227_v33 }
 0x134   :  { %v253_v39 = vpop.f32.mrf.mxu3 }
 0x135   :  { %v254_v41 = vadd.f32 %v333_v21, %v253_v39 }
 0x137   :  { %274 = vst.msk [vmem:[%s563_s5 + $0x70] sm:$0xff] %vm259_vm1, %v254_v41 }
 0x138   :  { %v229_v34 = vpop.f32.mrf.mxu1 }
 0x139   :  { %v230_v35 = vadd.f32 %v333_v21, %v229_v34 }
 0x13b   :  { %266 = vst.msk [vmem:[%s563_s5 + $0x30] sm:$0xff] %vm259_vm1, %v230_v35 }
 0x13c   :  { %v256_v43 = vpop.f32.mrf.mxu3 }
 0x13d   :  { %v257_v45 = vadd.f32 %v333_v21, %v256_v43 }
 0x13f   :  { %275 = vst.msk [vmem:[%s563_s5 + $0x78] sm:$0xff] %vm259_vm1, %v257_v45 }
 0x146   :  { %v232_v36 = vpop.f32.mrf.mxu2 }
 0x147   :  { %v233_v37 = vadd.f32 %v333_v21, %v232_v36 }
 0x149   :  { %267 = vst.msk [vmem:[%s563_s5 + $0x38] sm:$0xff] %vm259_vm1, %v233_v37 }
 0x14e   :  { %v235_v38 = vpop.f32.mrf.mxu2 }
 0x14f   :  { %v236_v40 = vadd.f32 %v333_v21, %v235_v38 }
 0x151   :  { %268 = vst.msk [vmem:[%s563_s5 + $0x40] sm:$0xff] %vm259_vm1, %v236_v40 }
 0x156   :  { %v238_v42 = vpop.f32.mrf.mxu2 }
 0x157   :  { %v239_v44 = vadd.f32 %v333_v21, %v238_v42 }
 0x159   :  { %269 = vst.msk [vmem:[%s563_s5 + $0x48] sm:$0xff] %vm259_vm1, %v239_v44 }
 0x15e   :  { %v241_v46 = vpop.f32.mrf.mxu2 }
 0x15f   :  { %v242_v47 = vadd.f32 %v333_v21, %v241_v46 }
 0x161   :  { %270 = vst.msk [vmem:[%s563_s5 + $0x50] sm:$0xff] %vm259_vm1, %v242_v47 }
 0x166   :  { %v244_v48 = vpop.f32.mrf.mxu2 }
 0x167   :  { %v245_v49 = vadd.f32 %v333_v21, %v244_v48 }
 0x169   :  { %271 = vst.msk [vmem:[%s563_s5 + $0x58] sm:$0xff] %vm259_vm1, %v245_v49 }
 0x16e   :  { %v247_v50 = vpop.f32.mrf.mxu2 }
 0x16f   :  { %v248_v51 = vadd.f32 %v333_v21, %v247_v50 }
 0x171   :  { %272 = vst.msk [vmem:[%s563_s5 + $0x60] sm:$0xff] %vm259_vm1, %v248_v51 }
 0x176   :  { %v250_v52 = vpop.f32.mrf.mxu2 }
 0x177   :  { %v251_v53 = vadd.f32 %v333_v21, %v250_v52 }
 0x179   :  { %273 = vst.msk [vmem:[%s563_s5 + $0x68] sm:$0xff] %vm259_vm1, %v251_v53 }

</bundles_post_ra>
